<compile_context>
chip_gen: v7x
topology: tpu7x:2x2x1
jax: 0.10.0
libtpu: 0.0.40
codegen_flags: <defaults>
</compile_context>

<pallas_src>
import functools

import jax
import jax.numpy as jnp
from jax.experimental import pallas as pl
from jax.experimental.pallas import tpu as pltpu


def _round_up(x, m):
    return ((x + m - 1) // m) * m


def _vmem_capacity_bytes():
    try:
        info = pltpu.get_tpu_info()
        v = getattr(info, "vmem_capacity_bytes", None)
        if v:
            return int(v)
    except Exception:
        pass
    return 64 << 20   # conservative (v7x physical VMEM per TC)


def _num_tensorcores():
    # Best-effort: 2 only on multi-TC chips (v7x / v4 / v5p); 1 elsewhere.
    try:
        info = pltpu.get_tpu_info()
        for attr in ("num_cores", "tensor_cores_per_chip", "cores_per_chip",
                     "num_tensorcores"):
            v = getattr(info, attr, None)
            if v:
                return int(v)
    except Exception:
        pass
    try:
        kind = jax.devices()[0].device_kind.lower()
        if ("v7" in kind) or ("v4" in kind) or ("v5p" in kind):
            return 2
    except Exception:
        pass
    return 1


def _bce_kernel(w1_ref, x_ref, t_ref, out_ref, acc_ref, *,
                flipped, has_pw, valid_rows_last, needs_mask):
    s = pl.program_id(0)   # core-split axis (parallel)
    i = pl.program_id(1)   # row-block reduction axis (arbitrary)

    @pl.when(i == 0)
    def _():
        acc_ref[...] = jnp.zeros_like(acc_ref)

    x = x_ref[...].astype(jnp.float32)
    t = t_ref[...].astype(jnp.float32)

    # One stable softplus per element; flip folded algebraically.
    #   non-flipped: loss = (1 + t*w1)     * softplus(-x) + (1 - t) * x
    #   flipped:     loss = (1 + (1-t)*w1) * softplus(x)  - t * x
    # (w1 = effective_pos_weight - 1; effective pw already inverted in the wrapper
    #  for the flipped case, matching the module.)
    if flipped:
        sp = jnp.maximum(x, 0.0) + jnp.log1p(jnp.exp(-jnp.abs(x)))   # softplus(x)
        tw = 1.0 - t
        lin = -t * x
    else:
        sp = jnp.maximum(-x, 0.0) + jnp.log1p(jnp.exp(-jnp.abs(x)))  # softplus(-x)
        tw = t
        lin = (1.0 - t) * x

    if has_pw:
        w1 = w1_ref[...].astype(jnp.float32)            # (1, C) broadcast over rows
        loss = (1.0 + tw * w1) * sp + lin
    else:
        loss = sp + lin

    if needs_mask:
        # Only the very last block overall is a padded boundary block; keep the
        # select-based mask (garbage in the OOB region may be NaN/Inf) but pay for
        # it only there -- the steady-state body stays mask-free.
        is_last = jnp.logical_and(s == pl.num_programs(0) - 1,
                                  i == pl.num_programs(1) - 1)

        @pl.when(is_last)
        def _():
            rows = jax.lax.broadcasted_iota(jnp.int32, loss.shape, 0)
            acc_ref[...] += jnp.where(rows < valid_rows_last, loss, 0.0)

        @pl.when(jnp.logical_not(is_last))
        def _():
            acc_ref[...] += loss
    else:
        acc_ref[...] += loss

    @pl.when(i == pl.num_programs(1) - 1)
    def _():
        # Reduce the accumulator in-kernel: row 0 of the (8, C) output block holds
        # the per-column sums for this split; other rows are zero.
        col = jnp.sum(acc_ref[...], axis=0, keepdims=True)          # (1, C)
        rows8 = jax.lax.broadcasted_iota(jnp.int32, (8, 1), 0)
        out_ref[...] = jnp.where(rows8 == 0, col, 0.0)


def bce_with_logits_loss_flipped(logits, target, pos_weight=None, flipped=False,
                                 block_rows=None):
    """Scalar f32 loss matching BCEWithLogitsLossFlipped.forward (mean reduction)."""
    assert logits.shape == target.shape
    shape = logits.shape
    C = shape[-1] if len(shape) >= 1 else 1
    N = 1
    for d in shape[:-1]:
        N *= int(d)

    if not jnp.issubdtype(logits.dtype, jnp.floating):
        logits = logits.astype(jnp.float32)
    if not jnp.issubdtype(target.dtype, jnp.floating):
        # Keep targets narrow (0/1 exact in bf16) instead of widening to f32.
        target = target.astype(jnp.bfloat16)

    x2 = logits.reshape(N, C)
    t2 = target.reshape(N, C)

    # Lane-dense flatten for small C when it is a free (bitcast) reshape.
    lane = 128
    Nk, Ck = N, C
    tile_reps = 1
    if C < lane and lane % C == 0 and (N * C) % lane == 0:
        tile_reps = lane // C
        Nk = (N * C) // lane
        Ck = lane
        x2 = x2.reshape(Nk, Ck)
        t2 = t2.reshape(Nk, Ck)

    # pos_weight -> w1 = (effective pos_weight) - 1, laid out along the kernel lanes.
    has_pw = pos_weight is not None
    if has_pw:
        pw = jnp.asarray(pos_weight, jnp.float32).reshape(-1)
        pw = jnp.broadcast_to(pw, (C,))
        if flipped:
            pw = 1.0 / pw            # module stores 1/pos_weight when flipped
        w1 = pw - 1.0
        if tile_reps > 1:
            w1 = jnp.tile(w1, tile_reps)
        w1 = w1.reshape(1, Ck)
    else:
        w1 = jnp.zeros((1, Ck), jnp.float32)

    # --- Tile sizing (generation-aware) -------------------------------------
    x_sz = x2.dtype.itemsize
    t_sz = t2.dtype.itemsize
    vmem_cap = _vmem_capacity_bytes()
    per_row = Ck * (2 * x_sz + 2 * t_sz + 4)        # double-buffered inputs + f32 acc
    rows_by_budget = max(32, int(vmem_cap * 0.5) // max(per_row, 1))
    rows_by_target = max(32, (4 << 20) // max(Ck * 4, 1))   # ~4 MiB f32 tile target
    if block_rows is None:
        block_rows = min(rows_by_budget, rows_by_target)
    block_rows = max(32, (min(block_rows, rows_by_budget) // 32) * 32)
    block_rows = min(block_rows, max(32, _round_up(Nk, 32)))

    row_blocks = pl.cdiv(Nk, block_rows)

    # 2-way split across TensorCores only on multi-TC chips, and only when the row
    # blocks split evenly (avoids fully out-of-bounds boundary blocks).
    num_splits = 2 if (_num_tensorcores() >= 2 and row_blocks >= 2
                       and row_blocks % 2 == 0) else 1
    inner_blocks = row_blocks // num_splits

    needs_mask = (row_blocks * block_rows != Nk)
    valid_rows_last = Nk - (row_blocks - 1) * block_rows

    vmem_need = (block_rows * Ck * (2 * x_sz + 2 * t_sz + 4)
                 + 2 * num_splits * 8 * Ck * 4 + (2 << 20))
    vmem_limit = int(min(vmem_cap, max(2 * vmem_need, 32 << 20)))

    kernel = functools.partial(
        _bce_kernel, flipped=flipped, has_pw=has_pw,
        valid_rows_last=valid_rows_last, needs_mask=needs_mask)

    partials = pl.pallas_call(
        kernel,
        out_shape=jax.ShapeDtypeStruct((num_splits * 8, Ck), jnp.float32),
        grid_spec=pltpu.PrefetchScalarGridSpec(
            num_scalar_prefetch=0,
            grid=(num_splits, inner_blocks),
            in_specs=[
                pl.BlockSpec((1, Ck), lambda s, i: (0, 0)),                              # w1
                pl.BlockSpec((block_rows, Ck), lambda s, i: (s * inner_blocks + i, 0)),  # logits
                pl.BlockSpec((block_rows, Ck), lambda s, i: (s * inner_blocks + i, 0)),  # target
            ],
            out_specs=pl.BlockSpec((8, Ck), lambda s, i: (s, 0)),
            scratch_shapes=[pltpu.VMEM((block_rows, Ck), jnp.float32)],
        ),
        compiler_params=pltpu.CompilerParams(
            dimension_semantics=("parallel", "arbitrary"),
            vmem_limit_bytes=vmem_limit,
        ),
    )(w1, x2, t2)

    # Tiny (num_splits*8, Ck) reduction + mean scaling outside the hot loop.
    return jnp.sum(partials) * (1.0 / float(N * C))


# ---------------------------------------------------------------------------
# Reference + self-test
# ---------------------------------------------------------------------------
def _softplus(x):
    return jnp.maximum(x, 0.0) + jnp.log1p(jnp.exp(-jnp.abs(x)))


def _reference(logits, target, pos_weight=None, flipped=False):
    x = jnp.asarray(logits, jnp.float32)
    t = jnp.asarray(target, jnp.float32)
    if pos_weight is None:
        pw = jnp.ones((x.shape[-1],), jnp.float32)
    else:
        pw = jnp.asarray(pos_weight, jnp.float32)
    if flipped:
        x, t, pw = -x, 1.0 - t, 1.0 / pw
    loss = pw * t * _softplus(-x) + (1.0 - t) * _softplus(x)
    return jnp.mean(loss)


if __name__ == "__main__":
    key = jax.random.PRNGKey(0)
    k1, k2, k3 = jax.random.split(key, 3)

    ok = True

    # Primary shapes: (B, Ccls, H, W); pos_weight broadcasts along the last dim (W).
    B, Ccls, H, W = 2, 4, 16, 16
    x = jax.random.normal(k1, (B, Ccls, H, W), jnp.float32) * 2.0
    t = (jax.random.uniform(k2, (B, Ccls, H, W)) > 0.5).astype(jnp.float32)
    pw = jax.random.uniform(k3, (W,), jnp.float32, 0.5, 2.0)

    for flipped in (False, True):
        for p in (pw, None):
            out = jax.block_until_ready(
                bce_with_logits_loss_flipped(x, t, p, flipped=flipped))
            ref = _reference(x, t, p, flipped=flipped)
            ok = ok and bool(jnp.allclose(out, ref, rtol=1e-5, atol=1e-5))

    # Boundary block + multi-step reduction + bool (narrow) targets, non-128 C.
    N2, C2 = 130, 96
    x2 = jax.random.normal(k1, (N2, C2), jnp.float32) * 3.0
    t2 = jax.random.uniform(k2, (N2, C2)) > 0.5      # bool targets stay narrow
    pw2 = jax.random.uniform(k3, (C2,), jnp.float32, 0.5, 2.0)
    out = jax.block_until_ready(
        bce_with_logits_loss_flipped(x2, t2, pw2, flipped=True, block_rows=32))
    ref = _reference(x2, t2.astype(jnp.float32), pw2, flipped=True)
    ok = ok and bool(jnp.allclose(out, ref, rtol=1e-5, atol=1e-5))

    if ok:
        print("KERNEL_OK")
    else:
        print("KERNEL_FAIL")
</pallas_src>

<mosaic_0001>
module attributes {stable_mosaic.version = 11 : i64} {
  func.func @_bce_kernel(%arg0: i32, %arg1: i32, %arg2: memref<1x128xf32, #tpu.memory_space<vmem>>, %arg3: memref<32x128xf32, #tpu.memory_space<vmem>>, %arg4: memref<32x128xf32, #tpu.memory_space<vmem>>, %arg5: memref<8x128xf32, #tpu.memory_space<vmem>>, %arg6: memref<32x128xf32, #tpu.memory_space<vmem>>) attributes {dimension_semantics = [#tpu.dimension_semantics<parallel>, #tpu.dimension_semantics<arbitrary>], iteration_bounds = array<i64: 1, 1>, scalar_prefetch = 0 : i64, scratch_operands = 1 : i64, tpu.core_type = #tpu.core_type<tc>, window_params = [{pipeline_mode = #tpu.pipeline_mode<synchronous>, transform_indices = @transform_0, window_bounds = array<i64: 1, 128>}, {transform_indices = @transform_1, window_bounds = array<i64: 32, 128>}, {transform_indices = @transform_2, window_bounds = array<i64: 32, 128>}, {transform_indices = @transform_3, window_bounds = array<i64: 8, 128>}]} {
    %c0_i32 = arith.constant 0 : i32
    %0 = arith.cmpi eq, %arg1, %c0_i32 : i32
    %1 = arith.extui %0 : i1 to i32
    %c0_i32_0 = arith.constant 0 : i32
    %2 = arith.cmpi ne, %1, %c0_i32_0 : i32
    scf.if %2 {
      %cst_16 = arith.constant 0.000000e+00 : f32
      %36 = vector.broadcast %cst_16 : f32 to vector<32x128xf32>
      %c0_17 = arith.constant 0 : index
      %c0_18 = arith.constant 0 : index
      %37 = vector.load %arg6[%c0_17, %c0_18] : memref<32x128xf32, #tpu.memory_space<vmem>>, vector<32x128xf32>
      tpu.vector_store %arg6[%c0_17, %c0_18], %36 {strides = array<i32>} : memref<32x128xf32, #tpu.memory_space<vmem>>, vector<32x128xf32>,
    } else {
    }
    %c0 = arith.constant 0 : index
    %c0_1 = arith.constant 0 : index
    %3 = vector.load %arg3[%c0, %c0_1] : memref<32x128xf32, #tpu.memory_space<vmem>>, vector<32x128xf32>
    %c0_2 = arith.constant 0 : index
    %c0_3 = arith.constant 0 : index
    %4 = vector.load %arg4[%c0_2, %c0_3] : memref<32x128xf32, #tpu.memory_space<vmem>>, vector<32x128xf32>
    %cst = arith.constant 0.000000e+00 : f32
    %5 = vector.broadcast %cst : f32 to vector<32x128xf32>
    %6 = arith.subf %5, %3 : vector<32x128xf32>
    %cst_4 = arith.constant 0.000000e+00 : f32
    %7 = vector.broadcast %cst_4 : f32 to vector<32x128xf32>
    %8 = arith.maximumf %6, %7 : vector<32x128xf32>
    %9 = math.absf %3 : vector<32x128xf32>
    %cst_5 = arith.constant 0.000000e+00 : f32
    %10 = vector.broadcast %cst_5 : f32 to vector<32x128xf32>
    %11 = arith.subf %10, %9 : vector<32x128xf32>
    %12 = math.exp %11 : vector<32x128xf32>
    %13 = math.log1p %12 : vector<32x128xf32>
    %14 = arith.addf %8, %13 : vector<32x128xf32>
    %cst_6 = arith.constant 1.000000e+00 : f32
    %15 = vector.broadcast %cst_6 : f32 to vector<32x128xf32>
    %16 = arith.subf %15, %4 : vector<32x128xf32>
    %17 = arith.mulf %16, %3 : vector<32x128xf32>
    %c0_7 = arith.constant 0 : index
    %c0_8 = arith.constant 0 : index
    %18 = vector.load %arg2[%c0_7, %c0_8] : memref<1x128xf32, #tpu.memory_space<vmem>>, vector<1x128xf32>
    %19 = vector.broadcast %18 : vector<1x128xf32> to vector<32x128xf32>
    %20 = arith.mulf %4, %19 : vector<32x128xf32>
    %cst_9 = arith.constant 1.000000e+00 : f32
    %21 = vector.broadcast %cst_9 : f32 to vector<32x128xf32>
    %22 = arith.addf %21, %20 : vector<32x128xf32>
    %23 = arith.mulf %22, %14 : vector<32x128xf32>
    %24 = arith.addf %23, %17 : vector<32x128xf32>
    %c0_i32_10 = arith.constant 0 : i32
    %25 = arith.cmpi eq, %arg0, %c0_i32_10 : i32
    %c0_i32_11 = arith.constant 0 : i32
    %26 = arith.cmpi eq, %arg1, %c0_i32_11 : i32
    %27 = arith.andi %25, %26 : i1
    %28 = arith.extui %27 : i1 to i32
    %c0_i32_12 = arith.constant 0 : i32
    %29 = arith.cmpi ne, %28, %c0_i32_12 : i32
    scf.if %29 {
      %36 = tpu.iota {dimensions = array<i32: 0>} : vector<32x128xi32>
      %c0_16 = arith.constant 0 : index
      %c0_17 = arith.constant 0 : index
      %37 = vector.load %arg6[%c0_16, %c0_17] : memref<32x128xf32, #tpu.memory_space<vmem>>, vector<32x128xf32>
      %c16_i32 = arith.constant 16 : i32
      %38 = vector.broadcast %c16_i32 : i32 to vector<32x128xi32>
      %39 = arith.cmpi slt, %36, %38 : vector<32x128xi32>
      %cst_18 = arith.constant 0.000000e+00 : f32
      %40 = vector.broadcast %cst_18 : f32 to vector<32x128xf32>
      %41 = arith.select %39, %24, %40 : vector<32x128xi1>, vector<32x128xf32>
      %42 = arith.addf %37, %41 : vector<32x128xf32>
      %c0_19 = arith.constant 0 : index
      %c0_20 = arith.constant 0 : index
      %43 = vector.load %arg6[%c0_19, %c0_20] : memref<32x128xf32, #tpu.memory_space<vmem>>, vector<32x128xf32>
      tpu.vector_store %arg6[%c0_19, %c0_20], %42 {strides = array<i32>} : memref<32x128xf32, #tpu.memory_space<vmem>>, vector<32x128xf32>,
    } else {
    }
    %true = arith.constant true
    %30 = arith.xori %27, %true : i1
    %31 = arith.extui %30 : i1 to i32
    %c0_i32_13 = arith.constant 0 : i32
    %32 = arith.cmpi ne, %31, %c0_i32_13 : i32
    scf.if %32 {
      %c0_16 = arith.constant 0 : index
      %c0_17 = arith.constant 0 : index
      %36 = vector.load %arg6[%c0_16, %c0_17] : memref<32x128xf32, #tpu.memory_space<vmem>>, vector<32x128xf32>
      %37 = arith.addf %36, %24 : vector<32x128xf32>
      %c0_18 = arith.constant 0 : index
      %c0_19 = arith.constant 0 : index
      %38 = vector.load %arg6[%c0_18, %c0_19] : memref<32x128xf32, #tpu.memory_space<vmem>>, vector<32x128xf32>
      tpu.vector_store %arg6[%c0_18, %c0_19], %37 {strides = array<i32>} : memref<32x128xf32, #tpu.memory_space<vmem>>, vector<32x128xf32>,
    } else {
    }
    %c0_i32_14 = arith.constant 0 : i32
    %33 = arith.cmpi eq, %arg1, %c0_i32_14 : i32
    %34 = arith.extui %33 : i1 to i32
    %c0_i32_15 = arith.constant 0 : i32
    %35 = arith.cmpi ne, %34, %c0_i32_15 : i32
    scf.if %35 {
      %c0_16 = arith.constant 0 : index
      %c0_17 = arith.constant 0 : index
      %36 = vector.load %arg6[%c0_16, %c0_17] : memref<32x128xf32, #tpu.memory_space<vmem>>, vector<32x128xf32>
      %cst_18 = arith.constant dense<0.000000e+00> : vector<128xf32>
      %37 = vector.multi_reduction <add>, %36, %cst_18 [0] : vector<32x128xf32> to vector<128xf32>
      %38 = vector.shape_cast %37 : vector<128xf32> to vector<1x128xf32>
      %39 = tpu.iota {dimensions = array<i32: 0>} : vector<8x1xi32>
      %c0_i32_19 = arith.constant 0 : i32
      %40 = vector.broadcast %c0_i32_19 : i32 to vector<8x1xi32>
      %41 = arith.cmpi eq, %39, %40 : vector<8x1xi32>
      %cst_20 = arith.constant 0.000000e+00 : f32
      %42 = vector.shape_cast %41 : vector<8x1xi1> to vector<8x1xi1>
      %43 = vector.broadcast %42 : vector<8x1xi1> to vector<8x128xi1>
      %44 = vector.shape_cast %38 : vector<1x128xf32> to vector<1x128xf32>
      %45 = vector.broadcast %44 : vector<1x128xf32> to vector<8x128xf32>
      %46 = vector.broadcast %cst_20 : f32 to vector<8x128xf32>
      %47 = arith.select %43, %45, %46 : vector<8x128xi1>, vector<8x128xf32>
      %c0_21 = arith.constant 0 : index
      %c0_22 = arith.constant 0 : index
      %48 = vector.load %arg5[%c0_21, %c0_22] : memref<8x128xf32, #tpu.memory_space<vmem>>, vector<8x128xf32>
      tpu.vector_store %arg5[%c0_21, %c0_22], %47 {strides = array<i32>} : memref<8x128xf32, #tpu.memory_space<vmem>>, vector<8x128xf32>,
    } else {
    }
    return
  }
  func.func @transform_0(%arg0: i32, %arg1: i32) -> (i32, i32) {
    %c0_i32 = arith.constant 0 : i32
    %c0_i32_0 = arith.constant 0 : i32
    %c0_i32_1 = arith.constant 0 : i32
    return %c0_i32, %c0_i32_0 : i32, i32
  }
  func.func @transform_1(%arg0: i32, %arg1: i32) -> (i32, i32) {
    %c1_i32 = arith.constant 1 : i32
    %0 = arith.muli %arg0, %c1_i32 : i32
    %1 = arith.addi %0, %arg1 : i32
    %c0_i32 = arith.constant 0 : i32
    %c0_i32_0 = arith.constant 0 : i32
    return %1, %c0_i32 : i32, i32
  }
  func.func @transform_2(%arg0: i32, %arg1: i32) -> (i32, i32) {
    %c1_i32 = arith.constant 1 : i32
    %0 = arith.muli %arg0, %c1_i32 : i32
    %1 = arith.addi %0, %arg1 : i32
    %c0_i32 = arith.constant 0 : i32
    %c0_i32_0 = arith.constant 0 : i32
    return %1, %c0_i32 : i32, i32
  }
  func.func @transform_3(%arg0: i32, %arg1: i32) -> (i32, i32) {
    %c0_i32 = arith.constant 0 : i32
    %c0_i32_0 = arith.constant 0 : i32
    return %arg0, %c0_i32 : i32, i32
  }
}

</mosaic_0001>

<bundles_post_ra>
// kernel: tpu_custom_call.1
= control target key start
LH: loop header
LB: loop body
LE: loop exit
PB: predicated region body
PF: predicated region fallthrough
CT: control target
= control target key end

     0   :  { %8 = vsyncpa [#allocation4], 0  ;;  %s456_s0 = inlined_call_operand.hbm [shape: f32[1,128], index: 0, kind: input, shape index: {}]   ;;  %s457_s1 = inlined_call_operand.hbm [shape: f32[16,128], index: 1, kind: input, shape index: {}]   ;;  %s458_s2 = inlined_call_operand.hbm [shape: f32[16,128], index: 2, kind: input, shape index: {}]   ;;  %s459_s3 = inlined_call_operand.hbm [shape: f32[8,128], index: 3, kind: output, shape index: {}]  }
   0x1   :  { %9 = vsyncpa [#allocation7], 0 }
   0x2   :  { %10 = vsyncpa [#allocation5], 0  ;;  %s382_s12 = smov [#allocation3]   ;;  %s288_s16 = scalar_lea.hbm %s456_s0, 16 }
   0x3   :  { %s17_s13 = sshll.u32 %s382_s12, 4  ;;  %p289_p0 = scmp.ne.s32.totalorder %s456_s0, %s288_s16  ;;  %s18_s13 = int_to_ptr.vmem [resolvable:$true] %s17_s13 }
   0x4   :  { %p292_p1 = scmp.lt.u32.totalorder %s288_s16, %s456_s0 }
   0x6   :  { %p294_p2 = pnand %p292_p1, %p289_p0 }
   0x8   :  { %297 = shalt.err (!%p294_p2)
}
   0x9   :  { %s298_s21 = scalar_lea.vmem %s18_s13, 16  ;;  %s302_s22 = scalar_lea.vmem %s18_s13, 32 }
   0xa   :  { %p299_p3 = scmp.ne.s32.totalorder %s18_s13, %s298_s21  ;;  %p303_p4 = scmp.lt.s32.totalorder %s18_s13, %s18_s13 }
   0xb   :  { %p304_p5 = scmp.lt.s32.totalorder %s302_s22, %s298_s21 }
   0xd   :  { %p305_p6 = por %p304_p5, %p303_p4 }
   0xf   :  { %p306_p7 = pnand %p305_p6, %p299_p3 }
  0x11   :  { %309 = shalt.err (!%p306_p7)
}
  0x12   :  { %20 = dma.hbm_to_vmem [thread:$0]  %s456_s0, 16, %s18_s13, [#allocation4]  }
  0x13   :  { %29 = vsyncadd [#allocation7], 256  ;;  %s383_s25 = smov [#allocation6]   ;;  %s310_s29 = scalar_lea.hbm %s457_s1, 256 }
  0x14   :  { %s34_s26 = sshll.u32 %s383_s25, 4  ;;  %p311_p8 = scmp.ne.s32.totalorder %s457_s1, %s310_s29  ;;  %s35_s26 = int_to_ptr.vmem [resolvable:$true] %s34_s26 }
  0x15   :  { %p314_p9 = scmp.lt.u32.totalorder %s310_s29, %s457_s1 }
  0x17   :  { %p316_p10 = pnand %p314_p9, %p311_p8 }
  0x19   :  { %319 = shalt.err (!%p316_p10)
}
  0x1a   :  { %s320_s7 = scalar_lea.vmem %s35_s26, 256  ;;  %s324_s0 = scalar_lea.vmem %s35_s26, 512 }
  0x1b   :  { %p321_p11 = scmp.ne.s32.totalorder %s35_s26, %s320_s7  ;;  %p325_p12 = scmp.lt.s32.totalorder %s35_s26, %s35_s26 }
  0x1c   :  { %p326_p13 = scmp.lt.s32.totalorder %s324_s0, %s320_s7 }
  0x1e   :  { %p327_p0 = por %p326_p13, %p325_p12 }
  0x20   :  { %p328_p1 = pnand %p327_p0, %p321_p11 }
  0x22   :  { %331 = shalt.err (!%p328_p1)
}
  0x23   :  { %s384_s8 = smov 128   ;;  %s385_s9 = smov 8  }
  0x24   :  { %40 = dma.hbm_to_vmem [thread:$0]  %s457_s1, 256, %s35_s26, [#allocation7], %s384_s8, %s384_s8, %s385_s9  }
  0x25   :  { %49 = vsyncadd [#allocation7], 256  ;;  %s386_s12 = smov [#allocation8]   ;;  %s332_s16 = scalar_lea.hbm %s458_s2, 256 }
  0x26   :  { %s54_s13 = sshll.u32 %s386_s12, 4  ;;  %p333_p2 = scmp.ne.s32.totalorder %s458_s2, %s332_s16  ;;  %s55_s13 = int_to_ptr.vmem [resolvable:$true] %s54_s13 }
  0x27   :  { %p336_p3 = scmp.lt.u32.totalorder %s332_s16, %s458_s2 }
  0x29   :  { %p338_p4 = pnand %p336_p3, %p333_p2 }
  0x2b   :  { %341 = shalt.err (!%p338_p4)
}
  0x2c   :  { %s342_s21 = scalar_lea.vmem %s55_s13, 256  ;;  %s346_s1 = scalar_lea.vmem %s55_s13, 512 }
  0x2d   :  { %p343_p5 = scmp.ne.s32.totalorder %s55_s13, %s342_s21  ;;  %p347_p6 = scmp.lt.s32.totalorder %s55_s13, %s55_s13 }
  0x2e   :  { %p348_p7 = scmp.lt.s32.totalorder %s346_s1, %s342_s21 }
  0x30   :  { %p349_p8 = por %p348_p7, %p347_p6 }
  0x32   :  { %p350_p9 = pnand %p349_p8, %p343_p5 }
  0x34   :  { %353 = shalt.err (!%p350_p9)
}
  0x35   :  { %60 = dma.hbm_to_vmem [thread:$0]  %s458_s2, 256, %s55_s13, [#allocation7], %s384_s8, %s384_s8, %s385_s9  }
  0x36   :  { %376 = dma.done.wait [#allocation4], 16  }
  0x37   :  { %377 = vsyncadd [#allocation4], 4294967280 }
  0x38   :  { %378 = dma.done.wait [#allocation7], 1024  }
  0x39   :  { %379 = vsyncadd [#allocation7], 4294966272  ;;  %v86_v0 = vld [vmem:[#allocation6] sm:$0xff]  ;;  %v87_v1 = vld [vmem:[#allocation6 + $0x8] sm:$0xff]  ;;  %v250_v49 = vlaneseq  ;;  %s387_s2 = smov [#allocation9]  }
  0x3a   :  { %v102_v2 = vand.u32 2147483647, %v86_v0  ;;  %v103_v3 = vand.u32 2147483647, %v87_v1  ;;  %v90_v14 = vld [vmem:[#allocation8] sm:$0xff]  ;;  %v91_v17 = vld [vmem:[#allocation8 + $0x8] sm:$0xff] }
  0x3b   :  { %v273_v16 = vld [vmem:[#allocation3] ss:$0 sm:$0xff]  ;;  %v94_v18 = vsub.f32 0.0, %v86_v0  ;;  %v95_v21 = vsub.f32 0.0, %v87_v1  ;;  %v158_v29 = vsub.f32 1.0, %v90_v14  ;;  %v159_v33 = vsub.f32 1.0, %v91_v17 }
  0x3c   :  { %v106_v4 = vsub.f32 0.0, %v102_v2  ;;  %v107_v5 = vsub.f32 0.0, %v103_v3  ;;  %v173_v23 = vmul.f32 %v273_v16, %v90_v14  ;;  %v174_v25 = vmul.f32 %v273_v16, %v91_v17  ;;  %s263_s24 = sshll.u32 %s387_s2, 4  ;;  %s264_s24 = int_to_ptr.vmem [resolvable:$true] %s263_s24 }
  0x3d   :  { %v98_v27 = vmax.f32 %v94_v18, 0.0  ;;  %v99_v31 = vmax.f32 %v95_v21, 0.0  ;;  %v162_v40 = vmul.f32 %v158_v29, %v86_v0  ;;  %v163_v42 = vmul.f32 %v159_v33, %v87_v1  ;;  %s354_s25 = scalar_lea.vmem %s264_s24, 128  ;;  %p359_p11 = scmp.lt.s32.totalorder %s264_s24, %s264_s24 }
  0x3e   :  { %v110_v6 = vmul.f32 1.442695, %v106_v4  ;;  %v112_v7 = vmul.f32 1.442695, %v107_v5  ;;  %v177_v35 = vadd.f32 1.0, %v173_v23  ;;  %v178_v37 = vadd.f32 1.0, %v174_v25  ;;  %p355_p10 = scmp.ne.s32.totalorder %s264_s24, %s354_s25  ;;  %p360_p12 = scmp.lt.s32.totalorder %s354_s25, %s354_s25 }
  0x3f   :  { %v251_v52 = vshrl.u32 %v250_v49, 7 }
  0x40   :  { %280 = vpow2.f32 %v110_v6  ;;  %p361_p13 = por %p360_p12, %p359_p11 }
  0x41   :  { %282 = vpow2.f32 %v112_v7  ;;  %vm252_vm2 = vcmp.eq.s32.totalorder %v251_v52, 0 }
  0x42   :  { %p362_p0 = pnand %p361_p13, %p355_p10 }
  0x4a   :  { %v281_v8 = vpop.eup %280 }
  0x4b   :  { %v283_v9 = vpop.eup %282  ;;  %v118_v10 = vadd.f32 1.0, %v281_v8  ;;  %v121_v12 = vmul.f32 -0.5, %v281_v8  ;;  %v124_v19 = vand.u32 2147483647, %v281_v8 }
  0x4c   :  { %v127_v11 = vadd.f32 1.0, %v283_v9  ;;  %v130_v13 = vmul.f32 -0.5, %v283_v9  ;;  %v133_v22 = vand.u32 2147483647, %v283_v9 }
  0x4d   :  { %284 = vlog2.f32 %v118_v10  ;;  %v122_v15 = vadd.f32 1.0, %v121_v12  ;;  %vm125_vm0 = vcmp.lt.f32.partialorder %v124_v19, 0.0004427343 }
  0x4e   :  { %286 = vlog2.f32 %v127_v11  ;;  %v131_v20 = vadd.f32 1.0, %v130_v13  ;;  %vm134_vm1 = vcmp.lt.f32.partialorder %v133_v22, 0.0004427343 }
  0x4f   :  { %v123_v24 = vmul.f32 %v281_v8, %v122_v15 }
  0x50   :  { %v132_v28 = vmul.f32 %v283_v9, %v131_v20 }
  0x57   :  { %v285_v26 = vpop.eup %284 }
  0x58   :  { %v287_v30 = vpop.eup %286  ;;  %v120_v32 = vmul.f32 0.6931472, %v285_v26 }
  0x59   :  { %v129_v34 = vmul.f32 0.6931472, %v287_v30 }
  0x5a   :  { %v126_v36 = vsel %vm125_vm0, %v123_v24, %v120_v32 }
  0x5b   :  { %v135_v38 = vsel %vm134_vm1, %v132_v28, %v129_v34  ;;  %v154_v39 = vadd.f32 %v126_v36, %v98_v27 }
  0x5c   :  { %v155_v41 = vadd.f32 %v135_v38, %v99_v31 }
  0x5d   :  { %v181_v43 = vmul.f32 %v177_v35, %v154_v39 }
  0x5e   :  { %v182_v44 = vmul.f32 %v178_v37, %v155_v41 }
  0x5f   :  { %v185_v45 = vadd.f32 %v181_v43, %v162_v40 }
  0x60   :  { %v186_v46 = vadd.f32 %v182_v44, %v163_v42 }
  0x62   :  { %v241_v47 = vadd.f32 %v186_v46, %v185_v45 }
  0x64   :  { %v244_v48 = vrot.slane %v241_v47, 4 }
  0x66   :  { %v245_v50 = vadd.f32 %v244_v48, %v241_v47 }
  0x68   :  { %v246_v51 = vrot.slane %v245_v50, 2 }
  0x6a   :  { %v247_v53 = vadd.f32 %v246_v51, %v245_v50 }
  0x6c   :  { %v248_v54 = vrot.slane %v247_v53, 1 }
  0x6e   :  { %v249_v55 = vadd.f32 %v248_v54, %v247_v53 }
  0x70   :  { %v255_v56 = vsel %vm252_vm2, %v249_v55, 0.0 }
  0x71   :  { %256 = vst [vmem:[#allocation9] sm:$0xff] %v255_v56 }
  0x72   :  { %365 = shalt.err (!%p362_p0)
}
  0x73   :  { %s366_s28 = scalar_lea.hbm %s459_s3, 128 }
  0x74   :  { %p367_p1 = scmp.ne.s32.totalorder %s459_s3, %s366_s28  ;;  %p370_p2 = scmp.lt.u32.totalorder %s366_s28, %s459_s3 }
  0x76   :  { %p372_p3 = pnand %p370_p2, %p367_p1 }
  0x78   :  { %375 = shalt.err (!%p372_p3)
}
  0x79   :  { %266 = dma.vmem_to_hbm [thread:$0]  %s264_s24, 128, %s459_s3, [#allocation5]  }
  0x7a   :  { %380 = dma.done.wait [#allocation5], 128  }
  0x7b   :  { %381 = vsyncadd [#allocation5], 4294967168 }
  0x7c   :  { %270 = vsyncpa [#allocation4], 1 }
  0x7d   :  { %271 = vsyncpa [#allocation7], 1 }
  0x7e   :  { %272 = vsyncpa [#allocation5], 1 }

</bundles_post_ra>
